<compile_context>
chip_gen: v7x
topology: tpu7x:2x2x1
jax: 0.10.0
libtpu: 0.0.40
codegen_flags: <defaults>
</compile_context>

<pallas_src>
import math
import numpy as np
import jax
import jax.numpy as jnp
from jax.experimental import pallas as pl
from jax.experimental.pallas import tpu as pltpu

_ROW_TILE = 256                   # stage-1 row tile (used when M is a multiple)
_SIM_TILE = 256                   # stage-2 output tile edge (matches 2x256^2 MXU)
_VMEM_LIMIT = 32 * 1024 * 1024    # explicit scoped-VMEM cap; safe on v5e/v6e/v7x
_EPS_SQ = 1e-24                   # F.normalize clamps the NORM at 1e-12 -> sum-sq 1e-24
                                  # (plain Python float -> jaxpr literal, NOT a captured const)


# ------------------------------ kernel helpers ------------------------------

def _nt_f32(a, b):
    """A @ B.T, contracting last dims, f32 accumulation on the MXU."""
    return jax.lax.dot_general(a, b, (((1,), (1,)), ((), ())),
                               preferred_element_type=jnp.float32)


def _normalize_rows_f32(y):
    # y * rsqrt(max(sum(y^2), eps^2)) == y / clamp_min(||y||_2, 1e-12); f32 math.
    sumsq = jnp.sum(y * y, axis=-1, keepdims=True)
    return y * jax.lax.rsqrt(jnp.maximum(sumsq, _EPS_SQ))


# -------- stage 1: (optional) Linear + L2-normalize: (M, C) -> (M, K) bf16 --

def _proj_norm_kernel(x_ref, w_ref, b_ref, yn_ref):
    x = x_ref[...].astype(jnp.bfloat16)          # single-pass bf16 MXU operands
    w = w_ref[...].astype(jnp.bfloat16)
    y = _nt_f32(x, w) + b_ref[...]               # Linear: x @ W.T + b (f32 accum)
    yn_ref[...] = _normalize_rows_f32(y).astype(yn_ref.dtype)


def _norm_kernel(x_ref, yn_ref):
    yn_ref[...] = _normalize_rows_f32(x_ref[...]).astype(yn_ref.dtype)


# -------- stage 2a: flat (M, M) similarity slab (tiny-N path) ----------------

def _sim_flat_kernel(row_ref, col_ref, sim_ref):
    sim_ref[...] = _nt_f32(row_ref[...], col_ref[...])


# -------- stage 2b: direct (B, B, N, N) einsum-layout similarity -------------

def _sim_block_kernel(row_ref, col_ref, sim_ref):
    # row_ref: (1, tn, K), col_ref: (1, tn, K), sim_ref: (1, 1, tn, tn)
    sim_ref[0, 0] = _nt_f32(row_ref[0], col_ref[0])


# ------------------------------- JAX wrappers --------------------------------

def _project_normalize(x2, W, b):
    M, C = x2.shape
    K = W.shape[0]
    tm = _ROW_TILE if M % _ROW_TILE == 0 else M
    return pl.pallas_call(
        _proj_norm_kernel,
        out_shape=jax.ShapeDtypeStruct((M, K), jnp.bfloat16),
        grid=(M // tm,),
        in_specs=[pl.BlockSpec((tm, C), lambda i: (i, 0)),
                  pl.BlockSpec((K, C), lambda i: (0, 0)),
                  pl.BlockSpec((1, K), lambda i: (0, 0))],
        out_specs=pl.BlockSpec((tm, K), lambda i: (i, 0)),
        compiler_params=pltpu.CompilerParams(
            dimension_semantics=("parallel",),
            vmem_limit_bytes=_VMEM_LIMIT),
    )(x2, W, b.reshape(1, K))


def _normalize_only(x2):
    M, C = x2.shape
    tm = _ROW_TILE if M % _ROW_TILE == 0 else M
    return pl.pallas_call(
        _norm_kernel,
        out_shape=jax.ShapeDtypeStruct((M, C), jnp.bfloat16),
        grid=(M // tm,),
        in_specs=[pl.BlockSpec((tm, C), lambda i: (i, 0))],
        out_specs=pl.BlockSpec((tm, C), lambda i: (i, 0)),
        compiler_params=pltpu.CompilerParams(
            dimension_semantics=("parallel",),
            vmem_limit_bytes=_VMEM_LIMIT),
    )(x2)


def _similarity_flat(yn, B, N):
    # Lane-dense flat (M, M) slab; layout plumbing to (B,B,N,N) in JAX (tiny N only).
    M, K = yn.shape
    tm = _SIM_TILE if M % _SIM_TILE == 0 else M
    cost = pl.CostEstimate(flops=2 * M * M * K, transcendentals=0,
                           bytes_accessed=M * M * 4 + 2 * M * K * 2)
    sim = pl.pallas_call(
        _sim_flat_kernel,
        out_shape=jax.ShapeDtypeStruct((M, M), jnp.float32),
        grid=(M // tm, M // tm),
        in_specs=[pl.BlockSpec((tm, K), lambda i, j: (i, 0)),
                  pl.BlockSpec((tm, K), lambda i, j: (j, 0))],
        out_specs=pl.BlockSpec((tm, tm), lambda i, j: (i, j)),
        compiler_params=pltpu.CompilerParams(
            dimension_semantics=("parallel", "parallel"),
            vmem_limit_bytes=_VMEM_LIMIT),
        cost_estimate=cost,
    )(yn, yn)
    # einsum('bik,ljk->blij'): (B*N, B*N) -> (B, N, B, N) -> (B, B, N, N)
    return sim.reshape(B, N, B, N).transpose(0, 2, 1, 3)


def _similarity_blocked(yn, B, N):
    # Writes the final (B, B, N, N) layout straight from the kernel (no
    # post-kernel transpose of the largest tensor).  Requires N % 128 == 0 so
    # every store stays unmasked / lane-dense.
    M, K = yn.shape
    yn3 = yn.reshape(B, N, K)                       # free metadata reshape
    tn = _SIM_TILE if N % _SIM_TILE == 0 else 128
    nt = N // tn
    cost = pl.CostEstimate(flops=2 * M * M * K, transcendentals=0,
                           bytes_accessed=M * M * 4 + 2 * B * M * K * 2)
    return pl.pallas_call(
        _sim_block_kernel,
        out_shape=jax.ShapeDtypeStruct((B, B, N, N), jnp.float32),
        grid=(B, B, nt, nt),
        in_specs=[pl.BlockSpec((1, tn, K), lambda i, j, ii, jj: (i, ii, 0)),
                  pl.BlockSpec((1, tn, K), lambda i, j, ii, jj: (j, jj, 0))],
        out_specs=pl.BlockSpec((1, 1, tn, tn),
                               lambda i, j, ii, jj: (i, j, ii, jj)),
        compiler_params=pltpu.CompilerParams(
            dimension_semantics=("parallel", "parallel", "parallel", "parallel"),
            vmem_limit_bytes=_VMEM_LIMIT),
        cost_estimate=cost,
    )(yn3, yn3)


def prototype_mapping_forward(features, W=None, b=None, if_proj=False):
    """features: (B, N, C) float32. Returns sim of shape (B, B, N, N) float32."""
    B, N, C = features.shape
    x2 = features.reshape(B * N, C)
    yn = _project_normalize(x2, W, b) if if_proj else _normalize_only(x2)
    if N % 128 == 0:
        return _similarity_blocked(yn, B, N)
    return _similarity_flat(yn, B, N)


# --------------------------- numpy float64 reference --------------------------

def reference(features, W=None, b=None):
    x = np.asarray(features, np.float64)
    if W is not None:
        x = x @ np.asarray(W, np.float64).T + np.asarray(b, np.float64)
    denom = np.maximum(np.linalg.norm(x, axis=2, keepdims=True), 1e-12)
    xn = x / denom
    return np.einsum('bik,ljk->blij', xn, xn)


# ------------------------------------ main ------------------------------------

if __name__ == "__main__":
    B, N, in_c, out_c = 2, 8, 32, 16          # if_proj=True: nn.Linear(32, 16)

    key = jax.random.PRNGKey(0)
    kx, kW, kb, kx2 = jax.random.split(key, 4)
    features = jax.random.normal(kx, (B, N, in_c), dtype=jnp.float32)
    bound = 1.0 / math.sqrt(in_c)
    W = jax.random.uniform(kW, (out_c, in_c), jnp.float32, -bound, bound)
    b = jax.random.uniform(kb, (out_c,), jnp.float32, -bound, bound)

    # projected path (if_proj=True), tiny-N flat-slab layout
    sim_p = jax.block_until_ready(
        prototype_mapping_forward(features, W=W, b=b, if_proj=True))
    np.testing.assert_allclose(np.asarray(sim_p),
                               reference(features, np.asarray(W), np.asarray(b)),
                               atol=2e-2, rtol=2e-2)
    assert sim_p.shape == (B, B, N, N)

    # plain path (if_proj=False, the module's default)
    sim_n = jax.block_until_ready(prototype_mapping_forward(features, if_proj=False))
    np.testing.assert_allclose(np.asarray(sim_n), reference(features),
                               atol=2e-2, rtol=2e-2)

    # lane-dense direct-layout path (N multiple of 128 -> kernel writes (B,B,N,N))
    B2, N2 = 2, 128
    feats2 = jax.random.normal(kx2, (B2, N2, in_c), dtype=jnp.float32)
    sim_d = jax.block_until_ready(
        prototype_mapping_forward(feats2, W=W, b=b, if_proj=True))
    np.testing.assert_allclose(np.asarray(sim_d),
                               reference(feats2, np.asarray(W), np.asarray(b)),
                               atol=2e-2, rtol=2e-2)
    assert sim_d.shape == (B2, B2, N2, N2)

    print("KERNEL_OK")
</pallas_src>

<mosaic_0001>
module attributes {stable_mosaic.version = 11 : i64} {
  func.func @_proj_norm_kernel(%arg0: i32, %arg1: memref<16x32xf32, #tpu.memory_space<vmem>>, %arg2: memref<16x32xf32, #tpu.memory_space<vmem>>, %arg3: memref<1x16xf32, #tpu.memory_space<vmem>>, %arg4: memref<16x16xbf16, #tpu.memory_space<vmem>>) attributes {dimension_semantics = [#tpu.dimension_semantics<parallel>], iteration_bounds = array<i64: 1>, scalar_prefetch = 0 : i64, scratch_operands = 0 : i64, tpu.core_type = #tpu.core_type<tc>, window_params = [{transform_indices = @transform_0, window_bounds = array<i64: 16, 32>}, {pipeline_mode = #tpu.pipeline_mode<synchronous>, transform_indices = @transform_1, window_bounds = array<i64: 16, 32>}, {pipeline_mode = #tpu.pipeline_mode<synchronous>, transform_indices = @transform_2, window_bounds = array<i64: 1, 16>}, {transform_indices = @transform_3, window_bounds = array<i64: 16, 16>}]} {
    %c0 = arith.constant 0 : index
    %c0_0 = arith.constant 0 : index
    %0 = vector.load %arg1[%c0, %c0_0] : memref<16x32xf32, #tpu.memory_space<vmem>>, vector<16x32xf32>
    %1 = arith.truncf %0 : vector<16x32xf32> to vector<16x32xbf16>
    %c0_1 = arith.constant 0 : index
    %c0_2 = arith.constant 0 : index
    %2 = vector.load %arg2[%c0_1, %c0_2] : memref<16x32xf32, #tpu.memory_space<vmem>>, vector<16x32xf32>
    %3 = arith.truncf %2 : vector<16x32xf32> to vector<16x32xbf16>
    %cst = arith.constant dense<0.000000e+00> : vector<16x16xf32>
    %4 = tpu.matmul %1, %3, %cst {dimension_numbers = #tpu.dot_dimension_numbers<[1], [1], [0], [0], [0, 0, 1, 0], [], []>} : vector<16x32xbf16>, vector<16x32xbf16>, vector<16x16xf32> -> vector<16x16xf32>
    %c0_3 = arith.constant 0 : index
    %c0_4 = arith.constant 0 : index
    %5 = vector.load %arg3[%c0_3, %c0_4] : memref<1x16xf32, #tpu.memory_space<vmem>>, vector<1x16xf32>
    %6 = vector.broadcast %5 : vector<1x16xf32> to vector<16x16xf32>
    %7 = arith.addf %4, %6 : vector<16x16xf32>
    %8 = arith.mulf %7, %7 : vector<16x16xf32>
    %cst_5 = arith.constant dense<0.000000e+00> : vector<16xf32>
    %9 = vector.multi_reduction <add>, %8, %cst_5 [1] : vector<16x16xf32> to vector<16xf32>
    %10 = vector.shape_cast %9 : vector<16xf32> to vector<16x1xf32>
    %cst_6 = arith.constant 1.000000e-24 : f32
    %11 = vector.broadcast %cst_6 : f32 to vector<16x1xf32>
    %12 = arith.maximumf %10, %11 : vector<16x1xf32>
    %13 = math.rsqrt %12 : vector<16x1xf32>
    %14 = vector.broadcast %13 : vector<16x1xf32> to vector<16x16xf32>
    %15 = arith.mulf %7, %14 : vector<16x16xf32>
    %16 = arith.truncf %15 : vector<16x16xf32> to vector<16x16xbf16>
    %c0_7 = arith.constant 0 : index
    %c0_8 = arith.constant 0 : index
    %17 = vector.load %arg4[%c0_7, %c0_8] : memref<16x16xbf16, #tpu.memory_space<vmem>>, vector<16x16xbf16>
    tpu.vector_store %arg4[%c0_7, %c0_8], %16 {strides = array<i32>} : memref<16x16xbf16, #tpu.memory_space<vmem>>, vector<16x16xbf16>,
    return
  }
  func.func @transform_0(%arg0: i32) -> (i32, i32) {
    %c0_i32 = arith.constant 0 : i32
    %c0_i32_0 = arith.constant 0 : i32
    return %arg0, %c0_i32 : i32, i32
  }
  func.func @transform_1(%arg0: i32) -> (i32, i32) {
    %c0_i32 = arith.constant 0 : i32
    %c0_i32_0 = arith.constant 0 : i32
    %c0_i32_1 = arith.constant 0 : i32
    return %c0_i32, %c0_i32_0 : i32, i32
  }
  func.func @transform_2(%arg0: i32) -> (i32, i32) {
    %c0_i32 = arith.constant 0 : i32
    %c0_i32_0 = arith.constant 0 : i32
    %c0_i32_1 = arith.constant 0 : i32
    return %c0_i32, %c0_i32_0 : i32, i32
  }
  func.func @transform_3(%arg0: i32) -> (i32, i32) {
    %c0_i32 = arith.constant 0 : i32
    %c0_i32_0 = arith.constant 0 : i32
    return %arg0, %c0_i32 : i32, i32
  }
}

</mosaic_0001>

<bundles_post_ra>
// kernel: tpu_custom_call.1
= control target key start
LH: loop header
LB: loop body
LE: loop exit
PB: predicated region body
PF: predicated region fallthrough
CT: control target
= control target key end

     0   :  { %8 = vsyncpa [#allocation3], 0  ;;  %s316_s0 = inlined_call_operand.hbm [shape: f32[16,32], index: 0, kind: input, shape index: {}]   ;;  %s317_s1 = inlined_call_operand.hbm [shape: f32[16,32], index: 1, kind: input, shape index: {}]   ;;  %s318_s2 = inlined_call_operand.vmem [shape: f32[1,16], index: 2, kind: input, shape index: {}]   ;;  %s319_s3 = inlined_call_operand.hbm [shape: bf16[16,16], index: 3, kind: output, shape index: {}]  }
   0x1   :  { %9 = vsyncpa [#allocation6], 0 }
   0x2   :  { %10 = vsyncpa [#allocation4], 0  ;;  %s248_s12 = smov [#allocation2]   ;;  %s176_s16 = scalar_lea.hbm %s316_s0, 256 }
   0x3   :  { %s16_s13 = sshll.u32 %s248_s12, 4  ;;  %p177_p0 = scmp.ne.s32.totalorder %s316_s0, %s176_s16  ;;  %s17_s13 = int_to_ptr.vmem [resolvable:$true] %s16_s13 }
   0x4   :  { %p180_p1 = scmp.lt.u32.totalorder %s176_s16, %s316_s0 }
   0x6   :  { %p182_p2 = pnand %p180_p1, %p177_p0 }
   0x8   :  { %185 = shalt.err (!%p182_p2)
}
   0x9   :  { %s186_s21 = scalar_lea.vmem %s17_s13, 256  ;;  %p191_p4 = scmp.lt.s32.totalorder %s17_s13, %s17_s13 }
   0xa   :  { %p187_p3 = scmp.ne.s32.totalorder %s17_s13, %s186_s21  ;;  %p192_p5 = scmp.lt.s32.totalorder %s186_s21, %s186_s21 }
   0xc   :  { %p193_p6 = por %p192_p5, %p191_p4 }
   0xe   :  { %p194_p7 = pnand %p193_p6, %p187_p3 }
  0x10   :  { %197 = shalt.err (!%p194_p7)
}
  0x11   :  { %s249_s22 = smov 128   ;;  %s250_s23 = smov 8  }
  0x12   :  { %22 = dma.hbm_to_vmem [thread:$0]  %s316_s0, 256, %s17_s13, [#allocation3], %s249_s22, %s249_s22, %s250_s23  }
  0x13   :  { %s251_s26 = smov [#allocation5]   ;;  %s198_s30 = scalar_lea.hbm %s317_s1, 256 }
  0x14   :  { %s28_s27 = sshll.u32 %s251_s26, 4  ;;  %p199_p8 = scmp.ne.s32.totalorder %s317_s1, %s198_s30  ;;  %s29_s27 = int_to_ptr.vmem [resolvable:$true] %s28_s27 }
  0x15   :  { %p202_p9 = scmp.lt.u32.totalorder %s198_s30, %s317_s1 }
  0x17   :  { %p204_p10 = pnand %p202_p9, %p199_p8 }
  0x19   :  { %207 = shalt.err (!%p204_p10)
}
  0x1a   :  { %s208_s8 = scalar_lea.vmem %s29_s27, 256  ;;  %p213_p12 = scmp.lt.s32.totalorder %s29_s27, %s29_s27 }
  0x1b   :  { %p209_p11 = scmp.ne.s32.totalorder %s29_s27, %s208_s8  ;;  %p214_p13 = scmp.lt.s32.totalorder %s208_s8, %s208_s8 }
  0x1d   :  { %p215_p0 = por %p214_p13, %p213_p12 }
  0x1f   :  { %p216_p1 = pnand %p215_p0, %p209_p11 }
  0x21   :  { %219 = shalt.err (!%p216_p1)
}
  0x22   :  { %34 = dma.hbm_to_vmem [thread:$0]  %s317_s1, 256, %s29_s27, [#allocation6], %s249_s22, %s249_s22, %s250_s23  }
  0x23   :  { %242 = dma.done.wait [#allocation3], 256  }
  0x24   :  { %243 = vsyncadd [#allocation3], 4294967040 }
  0x25   :  { %244 = dma.done.wait [#allocation6], 256  }
  0x26   :  { %245 = vsyncadd [#allocation6], 4294967040  ;;  %v252_v0 = vmov 0.0   ;;  %vm253_vm0 = vmmov 0   ;;  %v47_v1 = vld [vmem:[#allocation5] sm:$0xff]  ;;  %v48_v2 = vld [vmem:[#allocation5 + $0x8] sm:$0xff] }
  0x27   :  { %157 = vmatprep.subr.bf16.mxu0 %v252_v0  ;;  %159 = vmatprep.mubr.msk.bf16.mxu0 %vm253_vm0, %v252_v0  ;;  %vm57_vm1 = vcmask 261120   ;;  %v49_v3 = vpack.c.bf16 %v48_v2, %v47_v1  ;;  %v44_v5 = vld [vmem:[#allocation2] sm:$0xff]  ;;  %v45_v6 = vld [vmem:[#allocation2 + $0x8] sm:$0xff]  ;;  %vm107_vm2 = vcmask 130048   ;;  %vm128_vm3 = vcmask 125952  }
  0x28   :  { %v46_v7 = vpack.c.bf16 %v45_v6, %v44_v5  ;;  %v149_v8 = vld [vmem:[%s318_s2] ss:$0 sm:$0xff]  ;;  %s254_s2 = smov [#allocation7]  }
  0x29   :  { %v62_v4 = vsel %vm57_vm1, %v49_v3, 0  ;;  %s136_s11 = sshll.u32 %s254_s2, 4  ;;  %s137_s11 = int_to_ptr.vmem [resolvable:$true] %s136_s11 }
  0x2a   :  { %158 = vmatpush3.bf16.xpose.msra.mxu0 %v62_v4  ;;  %s220_s12 = scalar_lea.vmem %s137_s11, 128  ;;  %p225_p3 = scmp.lt.s32.totalorder %s137_s11, %s137_s11 }
  0x2b   :  { %p221_p2 = scmp.ne.s32.totalorder %s137_s11, %s220_s12  ;;  %p226_p4 = scmp.lt.s32.totalorder %s220_s12, %s220_s12 }
  0x2d   :  { %p227_p5 = por %p226_p4, %p225_p3 }
  0x2f   :  { %p228_p6 = pnand %p227_p5, %p221_p2 }
  0x31   :  { %160 = vmatmul.mubr.msk.bf16.vlgmr.msra.gmra.mrb[0].mxu0 %vm57_vm1, %v46_v7 }
 0x104   :  { %v98_v9 = vpop.f32.mrb[0].mxu0 }
 0x105   :  { %v99_v10 = vadd.f32 %v149_v8, %v98_v9  ;;  %v161_v11 = vpop.f32.mrb[1].mxu0 }
 0x106   :  { %v101_v12 = vpop.f32.mrb[2].mxu0 }
 0x107   :  { %v102_v13 = vadd.f32 %v149_v8, %v101_v12  ;;  %v162_v14 = vpop.f32.mrb[3].mxu0  ;;  %v105_v15 = vmul.f32 %v99_v10, %v99_v10 }
 0x109   :  { %v108_v16 = vsel %vm107_vm2, %v105_v15, 0.0  ;;  %v106_v17 = vmul.f32 %v102_v13, %v102_v13 }
 0x10a   :  { %109 = vadd.xlane.f32.xlu0 %v108_v16 }
 0x10b   :  { %v111_v18 = vsel %vm107_vm2, %v106_v17, 0.0 }
 0x10e   :  { %112 = vadd.xlane.f32.xlu0 %v111_v18 }
 0x197   :  { %v110_v19 = vpop.xlane.xlu0 %109 }
 0x198   :  { %v114_v20 = vmax.f32 %v110_v19, 1e-24 }
 0x19a   :  { %172 = vrsqrt.f32 %v114_v20 }
 0x19b   :  { %v113_v21 = vpop.xlane.xlu0 %112 }
 0x19c   :  { %v115_v22 = vmax.f32 %v113_v21, 1e-24 }
 0x19e   :  { %174 = vrsqrt.f32 %v115_v22 }
 0x1a4   :  { %v173_v23 = vpop.eup %172 }
 0x1a5   :  { %v118_v24 = vmul.f32 %v173_v23, %v99_v10 }
 0x1a7   :  { %v153_v25 = vpack.c.bf16 %v118_v24, %v118_v24 }
 0x1a8   :  { %v175_v26 = vpop.eup %174 }
 0x1a9   :  { %v119_v27 = vmul.f32 %v175_v26, %v102_v13  ;;  %129 = vst.msk [vmem:[#allocation7] sm:$0xf] %vm128_vm3, %v153_v25 }
 0x1ab   :  { %v154_v28 = vpack.c.bf16 %v119_v27, %v119_v27 }
 0x1ad   :  { %130 = vst.msk [vmem:[#allocation7 + $0x4] sm:$0xf] %vm128_vm3, %v154_v28 }
 0x1ae   :  { %231 = shalt.err (!%p228_p6)
}
 0x1af   :  { %s232_s15 = scalar_lea.hbm %s319_s3, 128 }
 0x1b0   :  { %p233_p7 = scmp.ne.s32.totalorder %s319_s3, %s232_s15  ;;  %p236_p8 = scmp.lt.u32.totalorder %s232_s15, %s319_s3 }
 0x1b2   :  { %p238_p9 = pnand %p236_p8, %p233_p7 }
 0x1b4   :  { %241 = shalt.err (!%p238_p9)
}
 0x1b5   :  { %s255_s20 = smov 64   ;;  %s256_s21 = smov 4  }
 0x1b6   :  { %142 = dma.vmem_to_hbm [thread:$0]  %s137_s11, 128, %s319_s3, [#allocation4], %s255_s20, %s255_s20, %s256_s21  }
 0x1b7   :  { %246 = dma.done.wait [#allocation4], 128  }
 0x1b8   :  { %247 = vsyncadd [#allocation4], 4294967168 }
 0x1b9   :  { %146 = vsyncpa [#allocation3], 1 }
 0x1ba   :  { %147 = vsyncpa [#allocation6], 1 }
 0x1bb   :  { %148 = vsyncpa [#allocation4], 1 }

</bundles_post_ra>
